<compile_context>
chip_gen: v5e
topology: v5e:2x2
jax: 0.10.0
libtpu: 0.0.40
codegen_flags: <defaults>
</compile_context>

<pallas_src>
import math
import functools

import numpy as np
import jax
import jax.numpy as jnp
from jax import lax
from jax.experimental import pallas as pl
from jax.experimental.pallas import tpu as pltpu


_VMEM_LIMIT = 32 * 1024 * 1024  # > v5e 16 MiB default; == v6e/v7x default.


def _q_tile(L_Q):
    """Pick an L_Q tile: 128/256 when divisible, else the full extent."""
    for t in (256, 128):
        if L_Q % t == 0:
            return t
    return L_Q


# ----------------------------------------------------------------------------
# Kernel 1: sparsity measure M per query.
#   M[i] = max_{k in sample(i)} (Q[i].K[k]) - (sum over samples with
#          multiplicity of Q[i].K[k]) / L_K
# The Q@K^T tile is a VMEM-only temporary; only M (tiny) is written to HBM.
# `cnt` is the per-(query,key) sample multiplicity (shared across all heads),
# which reproduces the reference's with-replacement sampled sum exactly.
# ----------------------------------------------------------------------------
def _probe_kernel(q_ref, k_ref, cnt_ref, m_ref):
    # q_ref: (1, tq, E)  k_ref: (1, L_K, E)  cnt_ref: (tq, L_K)  m_ref: (1, tq, 1)
    l_k = k_ref.shape[1]
    # MXU dot; operands keep their input dtype (bf16 stays bf16), f32 acc.
    s = lax.dot_general(q_ref[0], k_ref[0], (((1,), (1,)), ((), ())),
                        preferred_element_type=jnp.float32)      # (tq, L_K)
    cnt = cnt_ref[...]                                           # (tq, L_K) f32
    sampled = cnt > 0.0
    s_max = jnp.max(jnp.where(sampled, s, -1e30), axis=-1, keepdims=True)
    s_sum = jnp.sum(s * cnt, axis=-1, keepdims=True)
    m_ref[0] = s_max - s_sum * (1.0 / l_k)                       # (tq, 1)


def _probe_sparsity(q, k, cnt):
    BH, L_Q, E = q.shape
    _, L_K, _ = k.shape
    tq = _q_tile(L_Q)
    n_qt = L_Q // tq
    # Grid order: q-tile outer, head inner -> the shared `cnt` block is only
    # re-DMA'd when the q-tile changes (Pallas skips unchanged block indices).
    m = pl.pallas_call(
        _probe_kernel,
        out_shape=jax.ShapeDtypeStruct((BH, L_Q, 1), jnp.float32),
        grid=(n_qt, BH),
        in_specs=[
            pl.BlockSpec((1, tq, E), lambda qt, b: (b, qt, 0)),
            pl.BlockSpec((1, L_K, E), lambda qt, b: (b, 0, 0)),
            pl.BlockSpec((tq, L_K), lambda qt, b: (qt, 0)),
        ],
        out_specs=pl.BlockSpec((1, tq, 1), lambda qt, b: (b, qt, 0)),
        compiler_params=pltpu.CompilerParams(
            dimension_semantics=("parallel", "parallel"),
            vmem_limit_bytes=_VMEM_LIMIT),
    )(q, k, cnt)
    return m[..., 0]                                             # (BH, L_Q)


# ----------------------------------------------------------------------------
# Kernel 2: scores_top = Q_reduce @ K^T, ProbMask, softmax, attn @ V, and the
# scatter of the u updated rows into the (pre-computed) initial context using
# dynamic row stores (top-k indices from SMEM via scalar prefetch).
# ----------------------------------------------------------------------------
def _update_kernel(idx_ref, qr_ref, k_ref, v_ref, ctx_ref, thr_ref, out_ref,
                   *, scale, mask_flag):
    # idx_ref: SMEM (BH, u) int32 — scalar-prefetched top-k query positions.
    # qr_ref : (1, u, E)   k_ref: (1, L_K, E)   v_ref: (1, L_V, D)
    # ctx_ref/out_ref: (1, L_Q, D)              thr_ref: (1, u, 1) int32
    b = pl.program_id(0)
    u = qr_ref.shape[1]
    L_K = k_ref.shape[1]

    # scores_top = Q_reduce @ K^T on the MXU (operands keep input dtype).
    scores = lax.dot_general(qr_ref[0], k_ref[0], (((1,), (1,)), ((), ())),
                             preferred_element_type=jnp.float32) * scale

    if mask_flag:
        # ProbMask: the selected query at position t may only see keys <= t.
        key_pos = lax.broadcasted_iota(jnp.int32, (u, L_K), 1)
        scores = jnp.where(key_pos <= thr_ref[0], scores, -1e30)

    m = jnp.max(scores, axis=-1, keepdims=True)
    p = jnp.exp(scores - m)
    denom = jnp.sum(p, axis=-1, keepdims=True)
    attn = p * pl.reciprocal(denom, approx=True)                 # EUP divide

    upd = jnp.dot(attn.astype(v_ref.dtype), v_ref[0],
                  preferred_element_type=jnp.float32).astype(out_ref.dtype)

    # Initial context (cumsum / mean, computed O(L*D) in the wrapper) ...
    out_ref[0] = ctx_ref[0]
    # ... then scatter the u updated rows.  top-k indices are unique, and a
    # duplicate would simply overwrite (not corrupt) the same row.
    for i in range(u):
        row = idx_ref[b, i]
        out_ref[0, pl.ds(row, 1), :] = upd[i:i + 1, :]


def _update_context(m_top, q_red, k, v, ctx_init, *, scale, mask_flag):
    BH, u, E = q_red.shape
    _, L_K, _ = k.shape
    _, L_V, D = v.shape
    L_Q = ctx_init.shape[1]
    # Lane-padded VMEM copy of the thresholds for the ProbMask comparison.
    thr = m_top[:, :, None]                                      # (BH, u, 1)

    kern = functools.partial(_update_kernel, scale=scale, mask_flag=mask_flag)
    grid_spec = pltpu.PrefetchScalarGridSpec(
        num_scalar_prefetch=1,                                   # m_top -> SMEM
        grid=(BH,),
        in_specs=[
            pl.BlockSpec((1, u, E), lambda b, idx: (b, 0, 0)),
            pl.BlockSpec((1, L_K, E), lambda b, idx: (b, 0, 0)),
            pl.BlockSpec((1, L_V, D), lambda b, idx: (b, 0, 0)),
            pl.BlockSpec((1, L_Q, D), lambda b, idx: (b, 0, 0)),
            pl.BlockSpec((1, u, 1), lambda b, idx: (b, 0, 0)),
        ],
        out_specs=pl.BlockSpec((1, L_Q, D), lambda b, idx: (b, 0, 0)),
    )
    return pl.pallas_call(
        kern,
        out_shape=jax.ShapeDtypeStruct((BH, L_Q, D), v.dtype),
        grid_spec=grid_spec,
        compiler_params=pltpu.CompilerParams(
            dimension_semantics=("parallel",),
            vmem_limit_bytes=_VMEM_LIMIT),
    )(m_top, q_red, k, v, ctx_init, thr)


# ----------------------------------------------------------------------------
# Forward pass (mirrors ProbAttention.forward).
# ----------------------------------------------------------------------------
def prob_attention(queries, keys, values, attn_mask=None, *, sample_key,
                   mask_flag=True, factor=5, scale=None,
                   output_attention=False):
    # attn_mask is accepted but unused (the reference builds its own ProbMask).
    # nn.Dropout(attention_dropout) is defined in __init__ but never applied
    # in the reference forward, so there is nothing to emulate.
    del attn_mask
    B, L_Q, H, D = queries.shape
    _, L_K, _, _ = keys.shape
    _, L_V, _, Dv = values.shape

    q = jnp.transpose(queries, (0, 2, 1, 3)).reshape(B * H, L_Q, D)
    k = jnp.transpose(keys, (0, 2, 1, 3)).reshape(B * H, L_K, D)
    v = jnp.transpose(values, (0, 2, 1, 3)).reshape(B * H, L_V, Dv)

    U_part = min(factor * int(np.ceil(np.log(L_K))), L_K)
    u = min(factor * int(np.ceil(np.log(L_Q))), L_Q)

    # torch.randint -> jax.random.  Like the reference, ONE draw of sampled
    # key indices is shared across all (batch, head) pairs (do not "fix").
    index_sample = jax.random.randint(sample_key, (L_Q, U_part), 0, L_K)
    # Sample multiplicities (sampling is with replacement) -> exact sampled sum.
    cnt = jnp.zeros((L_Q, L_K), jnp.float32).at[
        jnp.arange(L_Q)[:, None], index_sample].add(1.0)

    # Sparsity measure M (kernel 1) and top-u query selection.
    M = _probe_sparsity(q, k, cnt)                               # (BH, L_Q)
    _, M_top = lax.top_k(M, u)
    M_top = M_top.astype(jnp.int32)                              # (BH, u)

    # Gather the u strongest queries; kernel 2 computes Q_reduce @ K^T itself.
    q_red = jnp.take_along_axis(q, M_top[:, :, None], axis=1)    # (BH, u, D)

    scale_val = float(scale) if scale else 1.0 / math.sqrt(D)

    # Initial context: O(L*D) cumsum / broadcast mean (no O(L^2*D) matmul,
    # no (L_Q, L_V) temporary).
    if mask_flag:
        assert L_Q == L_V
        ctx_init = jnp.cumsum(v, axis=1)
    else:
        ctx_init = jnp.broadcast_to(jnp.mean(v, axis=1, keepdims=True),
                                    (B * H, L_Q, Dv))

    ctx = _update_context(M_top, q_red, k, v, ctx_init,
                          scale=scale_val, mask_flag=mask_flag)  # (BH, L_Q, Dv)
    ctx = ctx.reshape(B, H, L_Q, Dv)

    # TODO(synk): output_attention=True (returning the dense L_V x L_V
    # attention map) is not implemented; reference default is False.
    return ctx, None


if __name__ == "__main__":
    root = jax.random.PRNGKey(0)
    kq, kk, kv, ks = jax.random.split(root, 4)

    B, L, H, D = 2, 8, 4, 32
    queries = jax.random.normal(kq, (B, L, H, D), jnp.float32)
    keys = jax.random.normal(kk, (B, L, H, D), jnp.float32)
    values = jax.random.normal(kv, (B, L, H, D), jnp.float32)

    # Masked (self-attention) path.
    context, attn = prob_attention(queries, keys, values, attn_mask=None,
                                   sample_key=ks, mask_flag=True)
    jax.block_until_ready(context)
    assert context.shape == (B, H, L, D)
    assert attn is None
    assert bool(jnp.all(jnp.isfinite(context)))
    # With u == L_Q every query is selected; the causally-masked query 0
    # attends only to key 0, so its context row must equal values[:, 0].
    ref_row0 = jnp.transpose(values, (0, 2, 1, 3))[:, :, 0, :]
    assert bool(jnp.allclose(context[:, :, 0, :], ref_row0, rtol=1e-2, atol=1e-2))

    # Unmasked (cross-attention style) path.
    context2, attn2 = prob_attention(queries, keys, values, attn_mask=None,
                                     sample_key=ks, mask_flag=False)
    jax.block_until_ready(context2)
    assert context2.shape == (B, H, L, D)
    assert attn2 is None
    assert bool(jnp.all(jnp.isfinite(context2)))

    print("KERNEL_OK")
</pallas_src>

<mosaic_0001>
module attributes {stable_mosaic.version = 11 : i64} {
  func.func @_probe_kernel(%arg0: i32, %arg1: i32, %arg2: memref<1x8x32xf32, #tpu.memory_space<vmem>>, %arg3: memref<1x8x32xf32, #tpu.memory_space<vmem>>, %arg4: memref<8x8xf32, #tpu.memory_space<vmem>>, %arg5: memref<1x8x1xf32, #tpu.memory_space<vmem>>) attributes {dimension_semantics = [#tpu.dimension_semantics<parallel>, #tpu.dimension_semantics<parallel>], iteration_bounds = array<i64: 1, 8>, scalar_prefetch = 0 : i64, scratch_operands = 0 : i64, tpu.core_type = #tpu.core_type<tc>, window_params = [{transform_indices = @transform_0, window_bounds = array<i64: 1, 8, 32>}, {transform_indices = @transform_1, window_bounds = array<i64: 1, 8, 32>}, {transform_indices = @transform_2, window_bounds = array<i64: 8, 8>}, {transform_indices = @transform_3, window_bounds = array<i64: 1, 8, 1>}]} {
    %c0 = arith.constant 0 : index
    %c0_0 = arith.constant 0 : index
    %c0_1 = arith.constant 0 : index
    %0 = vector.load %arg2[%c0, %c0_0, %c0_1] : memref<1x8x32xf32, #tpu.memory_space<vmem>>, vector<1x8x32xf32>
    %1 = vector.shape_cast %0 : vector<1x8x32xf32> to vector<8x32xf32>
    %c0_2 = arith.constant 0 : index
    %c0_3 = arith.constant 0 : index
    %c0_4 = arith.constant 0 : index
    %2 = vector.load %arg3[%c0_2, %c0_3, %c0_4] : memref<1x8x32xf32, #tpu.memory_space<vmem>>, vector<1x8x32xf32>
    %3 = vector.shape_cast %2 : vector<1x8x32xf32> to vector<8x32xf32>
    %cst = arith.constant dense<0.000000e+00> : vector<8x8xf32>
    %4 = tpu.matmul %1, %3, %cst {dimension_numbers = #tpu.dot_dimension_numbers<[1], [1], [0], [0], [0, 0, 1, 0], [], []>} : vector<8x32xf32>, vector<8x32xf32>, vector<8x8xf32> -> vector<8x8xf32>
    %c0_5 = arith.constant 0 : index
    %c0_6 = arith.constant 0 : index
    %5 = vector.load %arg4[%c0_5, %c0_6] : memref<8x8xf32, #tpu.memory_space<vmem>>, vector<8x8xf32>
    %cst_7 = arith.constant 0.000000e+00 : f32
    %6 = vector.broadcast %cst_7 : f32 to vector<8x8xf32>
    %7 = arith.cmpf ogt, %5, %6 : vector<8x8xf32>
    %cst_8 = arith.constant -1.000000e+30 : f32
    %8 = vector.broadcast %cst_8 : f32 to vector<8x8xf32>
    %9 = arith.select %7, %4, %8 : vector<8x8xi1>, vector<8x8xf32>
    %cst_9 = arith.constant dense<0xFF800000> : vector<8xf32>
    %10 = vector.multi_reduction <maximumf>, %9, %cst_9 [1] : vector<8x8xf32> to vector<8xf32>
    %11 = vector.shape_cast %10 : vector<8xf32> to vector<8x1xf32>
    %12 = arith.mulf %4, %5 : vector<8x8xf32>
    %cst_10 = arith.constant dense<0.000000e+00> : vector<8xf32>
    %13 = vector.multi_reduction <add>, %12, %cst_10 [1] : vector<8x8xf32> to vector<8xf32>
    %14 = vector.shape_cast %13 : vector<8xf32> to vector<8x1xf32>
    %cst_11 = arith.constant 1.250000e-01 : f32
    %15 = vector.broadcast %cst_11 : f32 to vector<8x1xf32>
    %16 = arith.mulf %14, %15 : vector<8x1xf32>
    %17 = arith.subf %11, %16 : vector<8x1xf32>
    %c0_12 = arith.constant 0 : index
    %c0_13 = arith.constant 0 : index
    %c0_14 = arith.constant 0 : index
    %18 = vector.load %arg5[%c0_12, %c0_13, %c0_14] : memref<1x8x1xf32, #tpu.memory_space<vmem>>, vector<1x8x1xf32>
    %19 = vector.shape_cast %18 : vector<1x8x1xf32> to vector<8x1xf32>
    %20 = vector.shape_cast %17 : vector<8x1xf32> to vector<1x8x1xf32>
    tpu.vector_store %arg5[%c0_12, %c0_13, %c0_14], %20 {strides = array<i32>} : memref<1x8x1xf32, #tpu.memory_space<vmem>>, vector<1x8x1xf32>,
    return
  }
  func.func @transform_0(%arg0: i32, %arg1: i32) -> (i32, i32, i32) {
    %c0_i32 = arith.constant 0 : i32
    %c0_i32_0 = arith.constant 0 : i32
    return %arg1, %arg0, %c0_i32 : i32, i32, i32
  }
  func.func @transform_1(%arg0: i32, %arg1: i32) -> (i32, i32, i32) {
    %c0_i32 = arith.constant 0 : i32
    %c0_i32_0 = arith.constant 0 : i32
    %c0_i32_1 = arith.constant 0 : i32
    return %arg1, %c0_i32, %c0_i32_0 : i32, i32, i32
  }
  func.func @transform_2(%arg0: i32, %arg1: i32) -> (i32, i32) {
    %c0_i32 = arith.constant 0 : i32
    %c0_i32_0 = arith.constant 0 : i32
    return %arg0, %c0_i32 : i32, i32
  }
  func.func @transform_3(%arg0: i32, %arg1: i32) -> (i32, i32, i32) {
    %c0_i32 = arith.constant 0 : i32
    %c0_i32_0 = arith.constant 0 : i32
    return %arg1, %arg0, %c0_i32 : i32, i32, i32
  }
}

</mosaic_0001>

<bundles_post_ra>
// kernel: tpu_custom_call.1
= control target key start
LH: loop header
LB: loop body
LE: loop exit
PB: predicated region body
PF: predicated region fallthrough
CT: control target
= control target key end

     0   :  { %s818_s0 = inlined_call_operand.hbm [shape: f32[8,8,32], index: 0, kind: input, shape index: {}]   ;;  %s819_s1 = inlined_call_operand.hbm [shape: f32[8,8,32], index: 1, kind: input, shape index: {}]   ;;  %s820_s2 = inlined_call_operand.hbm [shape: f32[8,8], index: 2, kind: input, shape index: {}]   ;;  %s821_s3 = inlined_call_operand.vmem [shape: f32[8,8,1], index: 3, kind: output, shape index: {}]  }
   0x1   :  { %823 = sst [smem:[#allocation10_spill]] %s820_s2 }
   0x2   :  { %8 = vsyncpa [#allocation3], 0 }
   0x3   :  { %10 = vsyncpa [#allocation3 + $0x1], 0 }
   0x4   :  { %11 = vsyncpa [#allocation5], 0 }
   0x5   :  { %13 = vsyncpa [#allocation5 + $0x1], 0  ;;  %s693_s12 = smov 0   ;;  %s695_s13 = smov 0  }
   0x6   :  { %s697_s14 = smov 0   ;;  %s699_s15 = smov 0  }
   0x7   :  { %s701_s16 = smov 0   ;;  %s703_s17 = smov 0  }
   0x8 LB: > { %s822_s18 = sadd.s32 4294967295, %s670_s17   ;;  %p53_p0 = scmp.ne.s32.totalorder %s654_s13, %s650_s12  ;;  %s670_s17 = sphi %s703_s17, %s19_s17   ;;  %s666_s16 = sphi %s701_s16, %s834_s16   ;;  %s662_s15 = sphi %s699_s15, %s833_s15   ;;  %s658_s14 = sphi %s697_s14, %s832_s14   ;;  %s654_s13 = sphi %s695_s13, %s831_s13   ;;  %s650_s12 = sphi %s693_s12, %s830_s12  }
   0x9   : > { %p725_p1 = scmp.eq.s32.totalorder %s822_s18, 0  ;;  %p435_p2 = scmp.ge.s32.totalorder %s670_s17, 1 }
   0xa   : > { %p144_p3 = scmp.lt.s32.totalorder %s670_s17, 9  ;;  %s826_s2 = sld [smem:[#allocation10_spill]] }
   0xb   : > { %p733_p4 = por %p725_p1, %p53_p0  ;;  %s672_s25 = smov [#allocation6]  }
   0xc   : > { %p740_p5 = pnand %p435_p2, %p144_p3  ;;  %s160_s26 = sshll.u32 %s672_s25, 4  ;;  %s161_s26 = int_to_ptr.vmem [resolvable:$true] %s160_s26 }
   0xd   : > { %s28_s27 = sadd.s32 1, %s666_s16  ;;  %s40_s28 = sadd.s32 1, %s658_s14 }
   0xe   : > { %p459_p6 = pneg %p740_p5  ;;  %p29_p8 = scmp.ge.s32.totalorder %s28_s27, 8 }
   0xf   : > { %p47_p9 = scmp.ne.s32.totalorder %s658_s14, %s654_s13  ;;  %p48_p10 = scmp.eq.s32.totalorder %s670_s17, 0 }
  0x10   : > { %s158_s23 = sshll.u32 %s826_s2, 4  ;;  %p460_p7 = pnand %p459_p6, %p725_p1  ;;  %s159_s23 = int_to_ptr.hbm [resolvable:$true] %s158_s23 }
  0x11   : > { %s836_s27 = smov (%p29_p8, %s28_s27), 0  ;;  %p755_p11 = por %p48_p10, %p47_p9 }
  0x12   : > { %462 = dma.hbm_to_vmem [thread:$0]  (!%p460_p7), %s159_s23, 128, %s161_s26, [#allocation5]  }
  0x13   : > { %p471_p12 = scmp.lt.s32.totalorder %s670_s17, 8  ;;  %s35_s30 = ssub.s32 %s666_s16, %s836_s27 }
  0x14   : > { %s171_s4 = sand.u32 1, %s658_s14   ;;  %p38_p13 = scmp.eq.s32.totalorder %s35_s30, 0 }
  0x15   : > { %s438_s5 = sshll.u32 %s171_s4, 3  ;;  %s439_s6 = sshll.u32 %s666_s16, 3 }
  0x16   : > { %s765_s7 = scalar_select %p38_p13, %s658_s14, %s40_s28  }
  0x17   : > { %s180_s10 = scalar_lea.hbm %s818_s0, %s439_s6  ;;  %s175_s12 = scalar_lea.vmem [#allocation2], %s438_s5 }
  0x18   : > { %s182_s11 = sshll.u32 %s180_s10, 4  ;;  %s184_s21 = sshll.u32 %s175_s12, 4  ;;  %s183_s11 = int_to_ptr.hbm [resolvable:$true] %s182_s11  ;;  %s185_s21 = int_to_ptr.vmem [resolvable:$true] %s184_s21 }
  0x19   : > { %p464_p0 = pnand %p471_p12, %p755_p11  ;;  %s199_s25 = scalar_lea.hbm %s819_s1, %s439_s6 }
  0x1a   : > { %s191_s26 = sand.u32 1, %s670_s17   ;;  %s172_s30 = scalar_lea.sflag [#allocation3], %s171_s4 }
  0x1b   : > { %466 = dma.hbm_to_vmem [thread:$0]  (!%p464_p0), %s183_s11, 128, %s185_s21, %s172_s30  }
  0x1c   : > { %s201_s28 = sshll.u32 %s199_s25, 4  ;;  %s195_s18 = scalar_lea.vmem [#allocation4], %s438_s5  ;;  %s202_s28 = int_to_ptr.hbm [resolvable:$true] %s201_s28 }
  0x1d   : > { %s203_s2 = sshll.u32 %s195_s18, 4  ;;  %s192_s8 = scalar_lea.sflag [#allocation5], %s191_s26  ;;  %s204_s2 = int_to_ptr.vmem [resolvable:$true] %s203_s2 }
  0x1e   : > { %469 = dma.hbm_to_vmem [thread:$0]  (!%p464_p0), %s202_s28, 128, %s204_s2, %s192_s8  }
  0x1f   : > { %212 = sbr.rel (%p740_p5) target bundleno = 303 (0x12f), region = 32  ;;  %s214_s29 = sand.u32 (!%p740_p5), 1, %s654_s13  }
  0x20   : > { %s443_s9 = sshll.u32 (!%p740_p5), %s214_s29, 3  ;;  %s215_s10 = scalar_lea.sflag (!%p740_p5), [#allocation3], %s214_s29 }
  0x21   : > { %s218_s12 = scalar_lea.vmem (!%p740_p5), [#allocation2], %s443_s9 }
  0x24   : > { %637 = dma.done.wait (%p733_p4), %s215_s10, 128  }
  0x25   : > { %639 = vsyncadd (%p733_p4), %s215_s10, 4294967168  ;;  %s829_s18 = sadd.s32 4294967295, %s670_s17   ;;  %s228_s2 = scalar_lea.vmem [#allocation4], %s443_s9 }
  0x26   : > { %s224_s4 = sand.u32 1, %s829_s18  }
  0x27   : > { %s225_s5 = scalar_lea.sflag [#allocation5], %s224_s4 }
  0x28   : > { %641 = dma.done.wait (%p733_p4), %s225_s5, 128  }
  0x29   : > { %643 = vsyncadd (%p733_p4), %s225_s5, 4294967168 }
  0x2a   : > { %645 = dma.done.wait (%p725_p1), [#allocation5], 128  }
  0x2b   : > { %647 = vsyncadd (%p725_p1), [#allocation5], 4294967168  ;;  %vm273_vm0 = vcmask 261120   ;;  %v272_v0 = vld [vmem:[%s228_s2] sm:$0xff]  ;;  %v271_v1 = vld [vmem:[%s218_s12] sm:$0xff]  ;;  %vm303_vm1 = vcmask 64512  }
  0x2c   : > { %447 = vmatpush.xpose.msk.msra.mxu0 %vm273_vm0, %v272_v0  ;;  %v300_v2 = vld [vmem:[#allocation6] sm:$0xff]  ;;  %p264_p2 = scmp.lt.s32.totalorder %s662_s15, 7  ;;  %vm313_vm3 = vcmask 7168  }
  0x2d   : > { %vm301_vm2 = vcmp.gt.f32.partialorder %v300_v2, 0.0 }
  0x2e   : > { %s838_s15 = smov (!%p264_p2, %s662_s15), 7 }
  0x2f   : > { %448 = vmatmul.msk.f32.vlgmr.msra.gmra.mxu0 %vm273_vm0, %v271_v1  ;;  %s446_s19 = sshll.u32 %s838_s15, 3 }
  0x30   : > { %s270_s6 = scalar_lea.vmem %s821_s3, %s446_s19 }
  0xac   : > { %v297_v3 = vpop.f32.mrf.mxu0 }
  0xad   : > { %v307_v4 = vmul.f32 %v300_v2, %v297_v3  ;;  %v302_v6 = vsel %vm301_vm2, %v297_v3, -1e+30 }
  0xae   : > { %v304_v7 = vsel %vm303_vm1, %v302_v6, -inf }
  0xaf   : > { %v308_v5 = vsel %vm303_vm1, %v307_v4, 0.0 }
  0xb0   : > { %309 = vadd.xlane.f32.xlu0 %v308_v5 }
  0xb8   : > { %305 = vmax.xlane.f32.xlu0 %v304_v7 }
 0x123   : > { %v310_v8 = vpop.xlane.xlu0 %309 }
 0x124   : > { %v311_v9 = vmul.f32 0.125, %v310_v8 }
 0x12b   : > { %v306_v10 = vpop.xlane.xlu0 %305 }
 0x12c   : > { %v312_v11 = vsub.f32 %v306_v10, %v311_v9 }
 0x12e   : > { %314 = vst.msk [vmem:[%s270_s6] sm:$0xff] %vm313_vm3, %v312_v11 }
 0x12f PF: > { %s19_s17 = sadd.s32 1, %s670_s17   ;;  %s830_s12 = smov %s654_s13 }
 0x130   : > { %p16_p1 = scmp.ge.s32.totalorder %s19_s17, 10   ;;  %s831_s13 = smov %s658_s14 }
 0x131   : > { %s832_s14 = smov %s765_s7  ;;  %s833_s15 = smov %s666_s16 }
 0x132   : > { %s834_s16 = smov %s836_s27  ;;  %18 = sbr.rel (!%p16_p1) target bundleno = 8 (0x8), region = 90 }
 0x137   :  { %340 = vsyncpa [#allocation3], 1 }
 0x138   :  { %342 = vsyncpa [#allocation3 + $0x1], 1 }
 0x139   :  { %343 = vsyncpa [#allocation5], 1 }
 0x13a   :  { %345 = vsyncpa [#allocation5 + $0x1], 1 }

</bundles_post_ra>
